<compile_context>
chip_gen: v7x
topology: tpu7x:2x2x1
jax: 0.10.0
libtpu: 0.0.40
codegen_flags: <defaults>
</compile_context>

<pallas_src>
import functools

import jax
import jax.numpy as jnp
from jax.experimental import pallas as pl
from jax.experimental.pallas import tpu as pltpu


def _round_up(v, m):
    return (v + m - 1) // m * m


def _gated_attention_kernel(x_ref, wvu_ref, bvu_ref, wwt_ref, bwt_ref, out_ref,
                            *, n_valid, d, tile_n):
    i = pl.program_id(0)
    n_tiles = pl.num_programs(0)

    # ---- per-tile gated attention logits --------------------------------
    x_t = x_ref[...]                                          # (tn, L) native dtype
    h = jnp.dot(x_t, wvu_ref[...],
                preferred_element_type=jnp.float32)           # (tn, 2D) f32, MXU
    h = h + bvu_ref[...].astype(jnp.float32)
    gated = jnp.tanh(h[:, :d]) * jax.nn.sigmoid(h[:, d:])     # (tn, D) f32, VPU/EUP

    # (K, D) . (tn, D)^T -> (K, tn): produces the transposed logits directly,
    # no per-tile transpose needed.
    a_kt = jax.lax.dot_general(
        wwt_ref[...], gated.astype(wwt_ref.dtype),
        (((1,), (1,)), ((), ())),
        preferred_element_type=jnp.float32)                   # (K, tn) f32
    a_kt = a_kt + bwt_ref[...].astype(jnp.float32)            # + (K, 1)

    # Mask padded instance columns so they get zero softmax weight.
    col = jax.lax.broadcasted_iota(jnp.int32, (1, tile_n), 1) + i * tile_n
    a_kt = jnp.where(col < n_valid, a_kt, -1e30)

    # Stash this tile's logits in the resident (K, n_tiles, tn) output block.
    out_ref[:, pl.ds(i, 1), :] = a_kt[:, None, :]

    # ---- finalize: softmax over the whole instance axis -----------------
    @pl.when(i == n_tiles - 1)
    def _():
        logits = out_ref[...]                                 # (K, n_tiles, tn) f32
        m = jnp.max(logits, axis=(1, 2), keepdims=True)       # (K, 1, 1)
        e = jnp.exp(logits - m)
        s = jnp.sum(e, axis=(1, 2), keepdims=True)
        out_ref[...] = e / s


def attention_gated(x, wv, bv, wu, bu, ww, bw, *, tile_n=512):
    """Forward of Attention_Gated: returns the (K, N) softmax attention map.

    tile_n guidance: ~256-512 on v7x (64 MiB VMEM), up to 2048+ on v6e/v5e;
    it only needs to be a multiple of 8 (handled below).
    """
    n, l = x.shape
    d = wv.shape[1]
    k = ww.shape[1]

    # Fuse the V / U gating projections into one (L, 2D) weight / (1, 2D) bias.
    wvu = jnp.concatenate([wv, wu], axis=1)                   # (L, 2D)
    bvu = jnp.concatenate([bv, bu], axis=1)                   # (1, 2D)
    wwt = jnp.transpose(ww)                                   # (K, D)
    bwt = jnp.reshape(bw, (k, 1))                             # (K, 1)

    # Tile the instance axis; pad N so every tile is full (padded rows masked).
    tn = min(_round_up(tile_n, 8), _round_up(n, 8))
    n_pad = _round_up(n, tn)
    n_tiles = n_pad // tn
    if n_pad != n:
        x = jnp.pad(x, ((0, n_pad - n), (0, 0)))

    # Explicit VMEM budget: double-buffered x tile + weights + resident logits
    # + slack for the (tn, 2D)/(tn, D) intermediates.
    x_bytes = 2 * tn * l * x.dtype.itemsize
    w_bytes = 2 * (wvu.size * wvu.dtype.itemsize + bvu.size * bvu.dtype.itemsize
                   + wwt.size * wwt.dtype.itemsize + bwt.size * bwt.dtype.itemsize)
    out_bytes = 2 * _round_up(k, 8) * n_tiles * _round_up(tn, 128) * 4
    tmp_bytes = 4 * tn * (3 * d + max(k, 8)) * 4
    vmem_limit = int(min(64 * 1024 * 1024,
                         max(8 * 1024 * 1024,
                             2 * (x_bytes + w_bytes + out_bytes + tmp_bytes))))

    kernel = functools.partial(_gated_attention_kernel,
                               n_valid=n, d=d, tile_n=tn)

    out = pl.pallas_call(
        kernel,
        out_shape=jax.ShapeDtypeStruct((k, n_tiles, tn), jnp.float32),
        grid_spec=pltpu.PrefetchScalarGridSpec(
            num_scalar_prefetch=0,
            grid=(n_tiles,),
            in_specs=[
                pl.BlockSpec((tn, l), lambda i: (i, 0)),      # x: streamed tiles
                pl.BlockSpec((l, 2 * d), lambda i: (0, 0)),   # fused Wv|Wu (loaded once)
                pl.BlockSpec((1, 2 * d), lambda i: (0, 0)),   # fused bv|bu
                pl.BlockSpec((k, d), lambda i: (0, 0)),       # Ww^T
                pl.BlockSpec((k, 1), lambda i: (0, 0)),       # bw^T
            ],
            out_specs=pl.BlockSpec((k, n_tiles, tn), lambda i: (0, 0, 0)),
        ),
        compiler_params=pltpu.CompilerParams(
            dimension_semantics=("arbitrary",),   # N carries the softmax reduction
            vmem_limit_bytes=vmem_limit),
    )(x, wvu, bvu, wwt, bwt)

    # (K, n_tiles, tn) -> (K, N): contiguous reshape + drop padded columns.
    return out.reshape(k, n_pad)[:, :n]


def _reference(x, wv, bv, wu, bu, ww, bw):
    a_v = jnp.tanh(x @ wv + bv)
    a_u = jax.nn.sigmoid(x @ wu + bu)
    a = (a_v * a_u) @ ww + bw            # (N, K)
    return jax.nn.softmax(a.T, axis=1)   # (K, N)


if __name__ == "__main__":
    # Small shapes consistent with Attention_Gated(L, D, K): a bag of N
    # instances of L-dim features.  N is deliberately NOT a multiple of the
    # tile so the multi-tile streaming + padding/masking paths are exercised.
    N, L, D, K = 20, 32, 16, 1
    TILE_N = 8   # -> 3 grid steps (padded to 24 rows)

    key = jax.random.PRNGKey(0)
    ks = jax.random.split(key, 7)
    x  = jax.random.normal(ks[0], (N, L), dtype=jnp.float32)
    wv = jax.random.normal(ks[1], (L, D), dtype=jnp.float32) * 0.1
    bv = jax.random.normal(ks[2], (1, D), dtype=jnp.float32) * 0.1
    wu = jax.random.normal(ks[3], (L, D), dtype=jnp.float32) * 0.1
    bu = jax.random.normal(ks[4], (1, D), dtype=jnp.float32) * 0.1
    ww = jax.random.normal(ks[5], (D, K), dtype=jnp.float32) * 0.1
    bw = jax.random.normal(ks[6], (1, K), dtype=jnp.float32) * 0.1

    a = attention_gated(x, wv, bv, wu, bu, ww, bw, tile_n=TILE_N)
    a = jax.block_until_ready(a)

    ref = _reference(x, wv, bv, wu, bu, ww, bw)
    assert a.shape == (K, N), a.shape
    assert jnp.allclose(a, ref, atol=1e-4, rtol=1e-4), (a, ref)
    # Each attention head is a softmax over N instances -> rows sum to 1.
    assert jnp.allclose(jnp.sum(a, axis=1), 1.0, atol=1e-5)

    print("KERNEL_OK")
</pallas_src>

<mosaic_0001>
module attributes {stable_mosaic.version = 11 : i64} {
  func.func @_gated_attention_kernel(%arg0: i32, %arg1: memref<8x32xf32, #tpu.memory_space<vmem>>, %arg2: memref<32x32xf32, #tpu.memory_space<vmem>>, %arg3: memref<1x32xf32, #tpu.memory_space<vmem>>, %arg4: memref<1x16xf32, #tpu.memory_space<vmem>>, %arg5: memref<1x1xf32, #tpu.memory_space<vmem>>, %arg6: memref<1x3x8xf32, #tpu.memory_space<vmem>>) attributes {dimension_semantics = [#tpu.dimension_semantics<arbitrary>], iteration_bounds = array<i64: 3>, scalar_prefetch = 0 : i64, scratch_operands = 0 : i64, tpu.core_type = #tpu.core_type<tc>, window_params = [{transform_indices = @transform_0, window_bounds = array<i64: 8, 32>}, {pipeline_mode = #tpu.pipeline_mode<synchronous>, transform_indices = @transform_1, window_bounds = array<i64: 32, 32>}, {pipeline_mode = #tpu.pipeline_mode<synchronous>, transform_indices = @transform_2, window_bounds = array<i64: 1, 32>}, {pipeline_mode = #tpu.pipeline_mode<synchronous>, transform_indices = @transform_3, window_bounds = array<i64: 1, 16>}, {pipeline_mode = #tpu.pipeline_mode<synchronous>, transform_indices = @transform_4, window_bounds = array<i64: 1, 1>}, {pipeline_mode = #tpu.pipeline_mode<synchronous>, transform_indices = @transform_5, window_bounds = array<i64: 1, 3, 8>}]} {
    %c0 = arith.constant 0 : index
    %c0_0 = arith.constant 0 : index
    %0 = vector.load %arg1[%c0, %c0_0] : memref<8x32xf32, #tpu.memory_space<vmem>>, vector<8x32xf32>
    %c0_1 = arith.constant 0 : index
    %c0_2 = arith.constant 0 : index
    %1 = vector.load %arg2[%c0_1, %c0_2] : memref<32x32xf32, #tpu.memory_space<vmem>>, vector<32x32xf32>
    %cst = arith.constant dense<0.000000e+00> : vector<8x32xf32>
    %2 = tpu.matmul %0, %1, %cst {dimension_numbers = #tpu.dot_dimension_numbers<[1], [0], [0], [1], [0, 0, 1, 1], [], []>} : vector<8x32xf32>, vector<32x32xf32>, vector<8x32xf32> -> vector<8x32xf32>
    %c0_3 = arith.constant 0 : index
    %c0_4 = arith.constant 0 : index
    %3 = vector.load %arg3[%c0_3, %c0_4] : memref<1x32xf32, #tpu.memory_space<vmem>>, vector<1x32xf32>
    %4 = vector.broadcast %3 : vector<1x32xf32> to vector<8x32xf32>
    %5 = arith.addf %2, %4 : vector<8x32xf32>
    %6 = vector.extract_strided_slice %5 {offsets = [0, 0], sizes = [8, 16], strides = [1, 1]} : vector<8x32xf32> to vector<8x16xf32>
    %7 = math.tanh %6 : vector<8x16xf32>
    %8 = vector.extract_strided_slice %5 {offsets = [0, 16], sizes = [8, 16], strides = [1, 1]} : vector<8x32xf32> to vector<8x16xf32>
    %9 = arith.negf %8 : vector<8x16xf32>
    %10 = math.exp %9 : vector<8x16xf32>
    %cst_5 = arith.constant 1.000000e+00 : f32
    %11 = vector.broadcast %cst_5 : f32 to vector<8x16xf32>
    %12 = arith.addf %11, %10 : vector<8x16xf32>
    %13 = arith.divf %11, %12 : vector<8x16xf32>
    %14 = arith.mulf %7, %13 : vector<8x16xf32>
    %c0_6 = arith.constant 0 : index
    %c0_7 = arith.constant 0 : index
    %15 = vector.load %arg4[%c0_6, %c0_7] : memref<1x16xf32, #tpu.memory_space<vmem>>, vector<1x16xf32>
    %cst_8 = arith.constant dense<0.000000e+00> : vector<1x8xf32>
    %16 = tpu.matmul %15, %14, %cst_8 {dimension_numbers = #tpu.dot_dimension_numbers<[1], [1], [0], [0], [0, 0, 1, 0], [], []>} : vector<1x16xf32>, vector<8x16xf32>, vector<1x8xf32> -> vector<1x8xf32>
    %c0_9 = arith.constant 0 : index
    %c0_10 = arith.constant 0 : index
    %17 = vector.load %arg5[%c0_9, %c0_10] : memref<1x1xf32, #tpu.memory_space<vmem>>, vector<1x1xf32>
    %18 = vector.broadcast %17 : vector<1x1xf32> to vector<1x8xf32>
    %19 = arith.addf %16, %18 : vector<1x8xf32>
    %20 = tpu.iota {dimensions = array<i32: 1>} : vector<1x8xi32>
    %c8_i32 = arith.constant 8 : i32
    %21 = arith.muli %arg0, %c8_i32 : i32
    %22 = vector.broadcast %21 : i32 to vector<1x8xi32>
    %23 = arith.addi %20, %22 : vector<1x8xi32>
    %c20_i32 = arith.constant 20 : i32
    %24 = vector.broadcast %c20_i32 : i32 to vector<1x8xi32>
    %25 = arith.cmpi slt, %23, %24 : vector<1x8xi32>
    %cst_11 = arith.constant -1.000000e+30 : f32
    %26 = vector.broadcast %cst_11 : f32 to vector<1x8xf32>
    %27 = arith.select %25, %19, %26 : vector<1x8xi1>, vector<1x8xf32>
    %28 = vector.shape_cast %27 : vector<1x8xf32> to vector<1x1x8xf32>
    %c0_12 = arith.constant 0 : index
    %29 = arith.index_cast %arg0 : i32 to index
    %c0_13 = arith.constant 0 : index
    %30 = vector.load %arg6[%c0_12, %29, %c0_13] : memref<1x3x8xf32, #tpu.memory_space<vmem>>, vector<1x1x8xf32>
    tpu.vector_store %arg6[%c0_12, %29, %c0_13], %28 {strides = array<i32>} : memref<1x3x8xf32, #tpu.memory_space<vmem>>, vector<1x1x8xf32>,
    %c2_i32 = arith.constant 2 : i32
    %31 = arith.cmpi eq, %arg0, %c2_i32 : i32
    %32 = arith.extui %31 : i1 to i32
    %c0_i32 = arith.constant 0 : i32
    %33 = arith.cmpi ne, %32, %c0_i32 : i32
    scf.if %33 {
      %c0_14 = arith.constant 0 : index
      %c0_15 = arith.constant 0 : index
      %c0_16 = arith.constant 0 : index
      %34 = vector.load %arg6[%c0_14, %c0_15, %c0_16] : memref<1x3x8xf32, #tpu.memory_space<vmem>>, vector<1x3x8xf32>
      %cst_17 = arith.constant dense<0xFF800000> : vector<1xf32>
      %35 = vector.multi_reduction <maximumf>, %34, %cst_17 [1, 2] : vector<1x3x8xf32> to vector<1xf32>
      %36 = vector.shape_cast %35 : vector<1xf32> to vector<1x1x1xf32>
      %37 = vector.broadcast %36 : vector<1x1x1xf32> to vector<1x3x8xf32>
      %38 = arith.subf %34, %37 : vector<1x3x8xf32>
      %39 = math.exp %38 : vector<1x3x8xf32>
      %cst_18 = arith.constant dense<0.000000e+00> : vector<1xf32>
      %40 = vector.multi_reduction <add>, %39, %cst_18 [1, 2] : vector<1x3x8xf32> to vector<1xf32>
      %41 = vector.shape_cast %40 : vector<1xf32> to vector<1x1x1xf32>
      %42 = vector.broadcast %41 : vector<1x1x1xf32> to vector<1x3x8xf32>
      %43 = arith.divf %39, %42 : vector<1x3x8xf32>
      %c0_19 = arith.constant 0 : index
      %c0_20 = arith.constant 0 : index
      %c0_21 = arith.constant 0 : index
      %44 = vector.load %arg6[%c0_19, %c0_20, %c0_21] : memref<1x3x8xf32, #tpu.memory_space<vmem>>, vector<1x3x8xf32>
      tpu.vector_store %arg6[%c0_19, %c0_20, %c0_21], %43 {strides = array<i32>} : memref<1x3x8xf32, #tpu.memory_space<vmem>>, vector<1x3x8xf32>,
    } else {
    }
    return
  }
  func.func @transform_0(%arg0: i32) -> (i32, i32) {
    %c0_i32 = arith.constant 0 : i32
    %c0_i32_0 = arith.constant 0 : i32
    return %arg0, %c0_i32 : i32, i32
  }
  func.func @transform_1(%arg0: i32) -> (i32, i32) {
    %c0_i32 = arith.constant 0 : i32
    %c0_i32_0 = arith.constant 0 : i32
    %c0_i32_1 = arith.constant 0 : i32
    return %c0_i32, %c0_i32_0 : i32, i32
  }
  func.func @transform_2(%arg0: i32) -> (i32, i32) {
    %c0_i32 = arith.constant 0 : i32
    %c0_i32_0 = arith.constant 0 : i32
    %c0_i32_1 = arith.constant 0 : i32
    return %c0_i32, %c0_i32_0 : i32, i32
  }
  func.func @transform_3(%arg0: i32) -> (i32, i32) {
    %c0_i32 = arith.constant 0 : i32
    %c0_i32_0 = arith.constant 0 : i32
    %c0_i32_1 = arith.constant 0 : i32
    return %c0_i32, %c0_i32_0 : i32, i32
  }
  func.func @transform_4(%arg0: i32) -> (i32, i32) {
    %c0_i32 = arith.constant 0 : i32
    %c0_i32_0 = arith.constant 0 : i32
    %c0_i32_1 = arith.constant 0 : i32
    return %c0_i32, %c0_i32_0 : i32, i32
  }
  func.func @transform_5(%arg0: i32) -> (i32, i32, i32) {
    %c0_i32 = arith.constant 0 : i32
    %c0_i32_0 = arith.constant 0 : i32
    %c0_i32_1 = arith.constant 0 : i32
    %c0_i32_2 = arith.constant 0 : i32
    return %c0_i32, %c0_i32_0, %c0_i32_1 : i32, i32, i32
  }
}

</mosaic_0001>

<bundles_post_ra>
// kernel: tpu_custom_call.1
= control target key start
LH: loop header
LB: loop body
LE: loop exit
PB: predicated region body
PF: predicated region fallthrough
CT: control target
= control target key end

     0   :  { %s930_s0 = inlined_call_operand.hbm [shape: f32[24,32], index: 0, kind: input, shape index: {}]   ;;  %s931_s1 = inlined_call_operand.hbm [shape: f32[32,32], index: 1, kind: input, shape index: {}]   ;;  %s932_s2 = inlined_call_operand.vmem [shape: f32[1,32], index: 2, kind: input, shape index: {}]   ;;  %s933_s3 = inlined_call_operand.vmem [shape: f32[1,16], index: 3, kind: input, shape index: {}]   ;;  %s934_s4 = inlined_call_operand.<no memory space> [shape: f32[1,1], index: 4, kind: input, shape index: {}]   ;;  %s935_s5 = inlined_call_operand.vmem [shape: f32[1,3,8], index: 5, kind: output, shape index: {}]  }
   0x1   :  { %v10_v0 = vstv %s934_s4 }
   0x2   :  { %11 = vst [vmem:[#allocation2] sm:$0x1] %v10_v0 }
   0x3   :  { %12 = vsyncpa [#allocation4], 0 }
   0x4   :  { %14 = vsyncpa [#allocation4 + $0x1], 0 }
   0x5   :  { %15 = vsyncpa [#allocation6], 0  ;;  %s775_s20 = smov 0   ;;  %s777_s21 = smov 0  }
   0x6   :  { %s779_s22 = smov 0   ;;  %s781_s23 = smov 0  }
   0x7 LB: > { %s794_s4 = sadd.s32 4294967295, %s731_s23   ;;  %p41_p0 = scmp.ne.s32.totalorder %s723_s21, %s719_s20  ;;  %s731_s23 = sphi %s781_s23, %s950_s23   ;;  %s727_s22 = sphi %s779_s22, %s949_s22   ;;  %s723_s21 = sphi %s777_s21, %s948_s21   ;;  %s719_s20 = sphi %s775_s20, %s947_s20  }
   0x8   : > { %p936_p1 = scmp.eq.s32.totalorder %s794_s4, 0  ;;  %p521_p2 = scmp.ge.s32.totalorder %s731_s23, 1 }
   0x9   : > { %p157_p3 = scmp.lt.s32.totalorder %s731_s23, 4  ;;  %s733_s26 = smov [#allocation5]  }
   0xa   : > { %p802_p4 = por %p936_p1, %p41_p0  ;;  %s169_s27 = sshll.u32 %s733_s26, 4  ;;  %s170_s27 = int_to_ptr.vmem [resolvable:$true] %s169_s27 }
   0xb   : > { %p806_p5 = pnand %p521_p2, %p157_p3  ;;  %s819_s29 = sadd.s32 1, %s731_s23  }
   0xc   : > { %s939_s24 = scalar_select %p802_p4, 1, 0 }
   0xd   : > { %s940_s25 = scalar_select %p806_p5, 1, 0 }
   0xe   : > { %p573_p6 = pneg %p806_p5  ;;  %s28_s30 = sadd.s32 1, %s727_s22 }
   0xf   : > { %s25_s6 = ssub.s32 %s731_s23, %s819_s29  ;;  %s635_s9 = scalar_lea.hbm %s931_s1, 512 }
  0x10   : > { %p814_p7 = pnand %p573_p6, %p936_p1  ;;  %p636_p8 = scmp.ne.s32.totalorder %s931_s1, %s635_s9 }
  0x11   : > { %p642_p12 = scmp.lt.u32.totalorder %s635_s9, %s931_s1 }
  0x12   : > { %p637_p9 = pneg %p814_p7 }
  0x14   : > { %p638_p10 = pnand %p637_p9, %p636_p8 }
  0x16   : > { %p639_p11 = pneg %p638_p10 }
  0x18   : > { %p644_p13 = pnand %p642_p12, %p639_p11 }
  0x1a   : > { %647 = shalt.err (!%p644_p13)
}
  0x1b   : > { %s648_s14 = scalar_lea.vmem %s170_s27, 512  ;;  %p656_p6 = scmp.lt.s32.totalorder %s170_s27, %s170_s27 }
  0x1c   : > { %p649_p0 = scmp.ne.s32.totalorder %s170_s27, %s648_s14  ;;  %p657_p1 = scmp.lt.s32.totalorder %s648_s14, %s648_s14 }
  0x1e   : > { %p651_p2 = pnand %p649_p0, %p637_p9  ;;  %p658_p4 = por %p657_p1, %p656_p6 }
  0x20   : > { %p652_p3 = pneg %p651_p2 }
  0x22   : > { %p659_p5 = pnand %p658_p4, %p652_p3 }
  0x24   : > { %662 = shalt.err (!%p659_p5)
}
  0x25   : > { %s734_s15 = smov 128   ;;  %s735_s16 = smov 8  }
  0x26   : > { %576 = dma.hbm_to_vmem [thread:$0]  (!%p814_p7), %s931_s1, 512, %s170_s27, [#allocation6], %s734_s15, %s734_s15, %s735_s16  }
  0x27   : > { %p26_p8 = scmp.eq.s32.totalorder %s25_s6, 0  ;;  %p35_p9 = scmp.ne.s32.totalorder %s727_s22, %s723_s21 }
  0x28   : > { %p36_p1 = scmp.eq.s32.totalorder %s731_s23, 0  ;;  %p582_p4 = scmp.lt.s32.totalorder %s731_s23, 3 }
  0x29   : > { %s845_s19 = scalar_select %p26_p8, %s727_s22, %s28_s30  }
  0x2a   : > { %p37_p5 = por %p36_p1, %p35_p9  ;;  %s192_s20 = sand.u32 1, %s727_s22  }
  0x2b   : > { %s524_s26 = sshll.u32 %s192_s20, 3  ;;  %s525_s7 = sshll.u32 %s731_s23, 7 }
  0x2c   : > { %s852_s10 = scalar_lea.hbm %s930_s0, %s525_s7  ;;  %s196_s27 = scalar_lea.vmem [#allocation3], %s524_s26 }
  0x2d   : > { %s203_s28 = sshll.u32 %s196_s27, 4  ;;  %p856_p7 = pnand %p582_p4, %p37_p5  ;;  %s854_s28 = int_to_ptr.vmem [resolvable:$true] %s203_s28 }
  0x2e   : > { %s193_s23 = scalar_lea.sflag [#allocation4], %s192_s20  ;;  %s663_s6 = scalar_lea.hbm %s852_s10, 128 }
  0x2f   : > { %p664_p10 = scmp.ne.s32.totalorder %s852_s10, %s663_s6  ;;  %p665_p11 = pneg %p856_p7 }
  0x30   : > { %s668_s13 = scalar_lea.hbm %s930_s0, 384  ;;  %p669_p0 = scmp.lt.u32.totalorder %s852_s10, %s930_s0 }
  0x31   : > { %p666_p12 = pnand %p665_p11, %p664_p10  ;;  %p670_p2 = scmp.lt.u32.totalorder %s668_s13, %s663_s6 }
  0x32   : > { %p672_p6 = scmp.lt.u32.totalorder %s663_s6, %s852_s10 }
  0x33   : > { %p667_p13 = pneg %p666_p12  ;;  %p671_p3 = por %p670_p2, %p669_p0 }
  0x35   : > { %p673_p8 = por %p672_p6, %p671_p3 }
  0x37   : > { %p674_p9 = pnand %p673_p8, %p667_p13 }
  0x39   : > { %677 = shalt.err (!%p674_p9)
}
  0x3a   : > { %s678_s16 = scalar_lea.vmem %s854_s28, 128  ;;  %s736_s17 = smov [#allocation3]  }
  0x3b   : > { %p679_p1 = scmp.ne.s32.totalorder %s854_s28, %s678_s16  ;;  %s683_s18 = sshll.u32 %s736_s17, 4  ;;  %s684_s18 = int_to_ptr.vmem [resolvable:$false] %s683_s18 }
  0x3c   : > { %s685_s20 = scalar_lea.vmem %s684_s18, 256  ;;  %p686_p10 = scmp.lt.s32.totalorder %s854_s28, %s684_s18 }
  0x3d   : > { %p681_p4 = pnand %p679_p1, %p665_p11  ;;  %p687_p12 = scmp.lt.s32.totalorder %s685_s20, %s678_s16 }
  0x3f   : > { %p682_p5 = pneg %p681_p4  ;;  %p688_p0 = por %p687_p12, %p686_p10 }
  0x41   : > { %p689_p2 = pnand %p688_p0, %p682_p5 }
  0x43   : > { %692 = shalt.err (!%p689_p2)
}
  0x44   : > { %580 = dma.hbm_to_vmem [thread:$0]  (!%p856_p7), %s852_s10, 128, %s854_s28, %s193_s23  }
  0x45   : > { %p943_p13 = scmp.ne.s32.totalorder %s940_s25, 0 }
  0x46   : > { %s214_s26 = sand.u32 (!%p943_p13), 1, %s723_s21   ;;  %p944_p11 = scmp.ne.s32.totalorder (!%p943_p13), %s939_s24, 0 }
  0x47   : > { %212 = sbr.rel (%p943_p13) target bundleno = 1014 (0x3f6), region = 40  ;;  %s527_s7 = sshll.u32 (!%p943_p13), %s214_s26, 3 }
  0x48   : > { %s215_s8 = scalar_lea.sflag (!%p943_p13), [#allocation4], %s214_s26  ;;  %s218_s9 = scalar_lea.vmem (!%p943_p13), [#allocation3], %s527_s7 }
  0x4e   : > { %710 = dma.done.wait (%p944_p11), %s215_s8, 128  }
  0x4f   : > { %712 = vsyncadd (%p944_p11), %s215_s8, 4294967168  ;;  %p945_p3 = scmp.eq.s32.totalorder %s794_s4, 0 }
  0x51   : > { %714 = dma.done.wait (%p945_p3), [#allocation6], 512   ;;  %p946_p6 = pmov %p945_p3 }
  0x52   : > { %v737_v1 = vmov 0.0|0.0   ;;  %vm738_vm0 = vmmov 0   ;;  %v739_v2 = vmov 0.0   ;;  %v245_v3 = vld [vmem:[#allocation5] sm:$0xff]  ;;  %v246_v4 = vld [vmem:[#allocation5 + $0x8] sm:$0xff]  ;;  %v247_v5 = vld [vmem:[#allocation5 + $0x10] sm:$0xff]  ;;  %v349_v24 = vlaneseq  ;;  %s437_s11 = scalar_lea.vmem %s935_s5, %s794_s4 }
  0x53   : > { %716 = vsyncadd (%p946_p6), [#allocation6], 4294966784  ;;  %561 = vmatprep.subr.bf16.mxu0 %v737_v1  ;;  %553 = vmatprep.mubr.msk.f32.mxu0 %vm738_vm0, %v739_v2  ;;  %v562_v6 = vpack.c.bf16 %v246_v4, %v245_v3  ;;  %v248_v7 = vld [vmem:[#allocation5 + $0x18] sm:$0xff]  ;;  %vm256_vm1 = vcmask 261120   ;;  %v529_v10 = vld [vmem:[%s932_s2] ss:$0 sm:$0xff] }
  0x54   : > { %556 = vmatprep.subr.mxu1 %v739_v2  ;;  %558 = vmatprep.mubr.msk.f32.mxu1 %vm738_vm0, %v739_v2  ;;  %v565_v8 = vpack.c.bf16 %v248_v7, %v247_v5  ;;  %v244_v9 = vld [vmem:[%s218_s9] sm:$0xff]  ;;  %v740_v17 = vmov 0   ;;  %s741_s10 = smov 112   ;;  %v343_v19 = vld [vmem:[#allocation2] sm:$0x1]  ;;  %vm353_vm2 = vcmask 130048  }
  0x55   : > { %563 = vmatpush3.bf16.msra.mxu0 %v562_v6  ;;  %624 = vset.pattern.permute.xlu0 %v740_v17  ;;  %v342_v23 = vld [vmem:[%s933_s3] sm:$0x1]  ;;  %v350_v25 = vshrl.u32 %v349_v24, 7  ;;  %s534_s30 = sshll.u32 %s794_s4, 3  ;;  %v431_v26 = vand.u32 127, %v349_v24  ;;  %vm438_vm4 = vcmask 57344  }
  0x56   : > { %564 = vmatprep.subr.bf16.mxu0 %v737_v1  ;;  %v433_v28 = vstv %s534_s30  ;;  %p535_p7 = scmp.ne.s32.totalorder %s794_s4, 2 }
  0x57   : > { %v351_v27 = vsub.s32 0, %v350_v25  ;;  %v434_v30 = vadd.s32 %v433_v28, %v431_v26  ;;  %vm445_vm5 = vcmask (!%p535_p7), 59392  }
  0x59   : > { %566 = vmatpush3.bf16.msra.mxu0 %v565_v8  ;;  %vm435_vm3 = vcmp.lt.s32.totalorder %v434_v30, 20 }
  0x5c   : > { %554 = vmatmul.mubr.msk.f32.vlgmr.msra.gmra.mrb[0].mxu0 %vm256_vm1, %v244_v9 }
 0x12f   : > { %v326_v11 = vpop.f32.mrb[0].mxu0 }
 0x130   : > { %v327_v12 = vadd.f32 %v529_v10, %v326_v11  ;;  %v555_v13 = vpop.f32.mrb[1].mxu0 }
 0x132   : > { %v531_v14 = vmul.f32 -1.442695, %v327_v12 }
 0x134   : > { %625 = vpow2.f32 %v531_v14 }
 0x13e   : > { %v626_v15 = vpop.eup %625 }
 0x13f   : > { %v334_v16 = vadd.f32 1.0, %v626_v15 }
 0x141   : > { %627 = vrcp.f32 %v334_v16 }
 0x142   : > { %629 = vtanh.f32 %v327_v12 }
 0x14b   : > { %v628_v18 = vpop.eup %627 }
 0x14c   : > { %338 = vrot.lane.b32.xlu0 %v628_v18, %s741_s10  ;;  %v630_v20 = vpop.eup %629 }
 0x150   : > { %346 = vperm.xlu0 %624, %v343_v19  }
 0x1be   : > { %v339_v21 = vpop.permute.xlu0 %338 }
 0x1bf   : > { %v341_v22 = vmul.f32 %v630_v20, %v339_v21 }
 0x1c1   : > { %557 = vmatpush3.xpose.msk.msra.mxu1 %vm353_vm2, %v341_v22 }
 0x1c4   : > { %559 = vmatmul.mubr.msk.f32.vlgmr.msra.gmra.mrb[0].mxu1 %vm353_vm2, %v342_v23 }
 0x1cf   : > { %v347_v29 = vpop.permute.xlu0 %346 }
 0x1d0   : > { %v352_v31 = vrot.slane %v347_v29, %v351_v27 }
 0x295   : > { %443 = sbr.rel (%p535_p7) target bundleno = 1014 (0x3f6), region = 52 }
 0x297   : > { %v426_v32 = vpop.f32.mrb[0].mxu1 }
 0x298   : > { %v427_v33 = vadd.f32 %v426_v32, %v352_v31  ;;  %v560_v34 = vpop.f32.mrb[1].mxu1 }
 0x29a   : > { %v436_v35 = vsel %vm435_vm3, %v427_v33, -1e+30 }
 0x29b   : > { %439 = vst.msk [vmem:[%s437_s11] sm:$0x1] %vm438_vm4, %v436_v35 }
 0x2a2   : > { %v444_v36 = vld [vmem:[%s935_s5] sm:$0x7] }
 0x2a3   : > { %v446_v37 = vsel %vm445_vm5, %v444_v36, -inf }
 0x2a4   : > { %447 = vmax.xlane.f32.xlu0 %v446_v37 }
 0x331   : > { %v448_v38 = vpop.xlane.xlu0 %447 }
 0x332   : > { %v449_v39 = vrot.slane %v448_v38, 4 }
 0x334   : > { %v450_v40 = vmax.f32 %v448_v38, %v449_v39 }
 0x336   : > { %v451_v41 = vrot.slane %v450_v40, 2 }
 0x338   : > { %v452_v42 = vmax.f32 %v450_v40, %v451_v41 }
 0x33a   : > { %v453_v43 = vrot.slane %v452_v42, 1 }
 0x33c   : > { %v454_v44 = vmax.f32 %v452_v42, %v453_v43 }
 0x33e   : > { %v455_v45 = vsub.f32 %v444_v36, %v454_v44 }
 0x340   : > { %v456_v46 = vmul.f32 1.442695, %v455_v45 }
 0x342   : > { %631 = vpow2.f32 %v456_v46 }
 0x34c   : > { %v632_v47 = vpop.eup %631 }
 0x34d   : > { %v458_v48 = vsel %vm445_vm5, %v632_v47, 0.0 }
 0x34e   : > { %459 = vadd.xlane.f32.xlu0 %v458_v48 }
 0x3db   : > { %v460_v49 = vpop.xlane.xlu0 %459 }
 0x3dc   : > { %v461_v50 = vrot.slane %v460_v49, 4 }
 0x3de   : > { %v462_v51 = vadd.f32 %v461_v50, %v460_v49 }
 0x3e0   : > { %v463_v52 = vrot.slane %v462_v51, 2 }
 0x3e2   : > { %v464_v53 = vadd.f32 %v463_v52, %v462_v51 }
 0x3e4   : > { %v465_v54 = vrot.slane %v464_v53, 1 }
 0x3e6   : > { %v466_v55 = vadd.f32 %v465_v54, %v464_v53 }
 0x3e8   : > { %633 = vrcp.f32 %v466_v55 }
 0x3f2   : > { %v634_v56 = vpop.eup %633 }
 0x3f3   : > { %v468_v57 = vmul.f32 %v634_v56, %v632_v47 }
 0x3f5   : > { %469 = vst.msk [vmem:[%s935_s5] sm:$0x7] %vm445_vm5, %v468_v57 }
 0x3f6 PF: > { %p18_p8 = scmp.ge.s32.totalorder %s819_s29, 5   ;;  %s947_s20 = smov %s723_s21 }
 0x3f7   : > { %s948_s21 = smov %s727_s22  ;;  %s949_s22 = smov %s845_s19 }
 0x3f8   : > { %s950_s23 = smov %s819_s29  ;;  %20 = sbr.rel (!%p18_p8) target bundleno = 7 (0x7), region = 85 }
 0x3ff   :  { %481 = vsyncpa [#allocation4], 1 }
 0x400   :  { %483 = vsyncpa [#allocation4 + $0x1], 1 }
 0x401   :  { %484 = vsyncpa [#allocation6], 1 }

</bundles_post_ra>
